<compile_context>
chip_gen: v5e
topology: v5e:2x2
jax: 0.10.0
libtpu: 0.0.40
codegen_flags: <defaults>
</compile_context>

<pallas_src>
import numpy as np
import jax
import jax.numpy as jnp
from jax.experimental import pallas as pl
from jax.experimental.pallas import tpu as pltpu

# ---- problem sizes implied by the module (x1 = torch.randn(1, 2, 6, 6)) ----
N, C_IN, H, W = 1, 2, 6, 6
POOL_K, POOL_S = 2, 3
PH = (H - POOL_K) // POOL_S + 1                         # 2
PW = (W - POOL_K) // POOL_S + 1                         # 2
C_OUT, K, STRIDE, PAD, DIL = 4, 3, 4, 1, 4
OH = (PH - 1) * STRIDE - 2 * PAD + DIL * (K - 1) + 1    # 11
OW = (PW - 1) * STRIDE - 2 * PAD + DIL * (K - 1) + 1    # 11
K_DIM = C_IN * PH * PW                                  # 8   (contraction dim)
K_AUG = K_DIM + 1                                       # 9   (+1 row for folded bias)
N_DIM = C_OUT * OH * OW                                 # 484 (flat output)
SUB, LANE = 8, 128                                      # one full f32 vreg (1024 elems)


def fused_kernel(x_ref, m_ref, o_ref):
    """Fused MaxPool (scalar unit) + scatter-matvec FMAs (VPU) + hardswish epilogue.

    x_ref : SMEM (C_IN*H*W,)        raw input, flat (ci, h, w) order
    m_ref : VMEM (K_AUG, 8, 128)    conv-transpose scatter matrix; row K_DIM = bias
    o_ref : VMEM (8, 128)           flat (padded) output, one full vreg
    """
    # --- MaxPool2d(2, stride=3): 8 pooled scalars, 24 scalar maxes (sregs, free) ---
    pooled = []
    for ci in range(C_IN):
        for ih in range(PH):
            for iw in range(PW):
                h0, w0 = ih * POOL_S, iw * POOL_S
                m = x_ref[ci * H * W + h0 * W + w0]
                for dh in range(POOL_K):
                    for dw in range(POOL_K):
                        if dh == 0 and dw == 0:
                            continue
                        m = jnp.maximum(m, x_ref[ci * H * W + (h0 + dh) * W + (w0 + dw)])
                pooled.append(m)

    # --- ConvTranspose2d as scalar-broadcast FMAs; bias row is the 9th term ---
    terms = [pooled[r] * m_ref[r] for r in range(K_DIM)]
    terms.append(m_ref[K_DIM])                    # folded bias (no 1.0 multiply)
    while len(terms) > 1:                         # pairwise tree reduce (depth 4)
        nxt = [terms[i] + terms[i + 1] for i in range(0, len(terms) - 1, 2)]
        if len(terms) % 2 == 1:
            nxt.append(terms[-1])
        terms = nxt
    acc = terms[0]

    # --- hardswish-style epilogue: v2 * clip(v2 + 3, 0, 6) / 6 ---
    v5 = jnp.clip(acc + 3.0, 0.0, 6.0)
    o_ref[...] = acc * v5 * (1.0 / 6.0)


def build_conv_transpose_matrix(weight, bias):
    """Host-side, built ONCE at init: ConvTranspose2d flattened to a dense
    (K_AUG, 8, 128) scatter tensor.  Flat output index n maps to (n // 128, n % 128);
    row K_DIM carries the bias; padded lanes (n >= N_DIM) stay zero."""
    w = np.asarray(weight, dtype=np.float32)      # (C_IN, C_OUT, K, K) torch layout
    b = np.asarray(bias, dtype=np.float32)        # (C_OUT,)
    m = np.zeros((K_AUG, SUB, LANE), dtype=np.float32)
    for ci in range(C_IN):
        for ih in range(PH):
            for iw in range(PW):
                row = ci * PH * PW + ih * PW + iw
                for co in range(C_OUT):
                    for kh in range(K):
                        for kw in range(K):
                            oh = ih * STRIDE - PAD + kh * DIL
                            ow = iw * STRIDE - PAD + kw * DIL
                            if 0 <= oh < OH and 0 <= ow < OW:
                                n = co * OH * OW + oh * OW + ow
                                # += : dilation/stride collisions must accumulate
                                m[row, n // LANE, n % LANE] += w[ci, co, kh, kw]
    for co in range(C_OUT):
        for idx in range(OH * OW):
            n = co * OH * OW + idx
            m[K_DIM, n // LANE, n % LANE] = b[co]  # folded bias row
    return jnp.asarray(m)


@jax.jit
def model_forward(x_nchw, m_aug):
    """Jitted forward: one grid-less pallas_call does pooling + matvec + epilogue."""
    x_flat = x_nchw.reshape(C_IN * H * W)          # N == 1; flat (ci, h, w) order

    out = pl.pallas_call(
        fused_kernel,
        out_shape=jax.ShapeDtypeStruct((SUB, LANE), jnp.float32),
        in_specs=[
            pl.BlockSpec(memory_space=pltpu.MemorySpace.SMEM),   # raw input scalars
            pl.BlockSpec(memory_space=pltpu.MemorySpace.VMEM),   # scatter matrix
        ],
        out_specs=pl.BlockSpec(memory_space=pltpu.MemorySpace.VMEM),
    )(x_flat, m_aug)

    # Pure layout plumbing: drop the zero padding and restore NCHW.
    return out.reshape(SUB * LANE)[:N_DIM].reshape(N, C_OUT, OH, OW)


def reference_forward(x, w, b):
    """Plain-numpy reference matching PyTorch semantics."""
    v1 = np.zeros((N, C_IN, PH, PW), dtype=np.float32)
    for n in range(N):
        for c in range(C_IN):
            for oh in range(PH):
                for ow in range(PW):
                    v1[n, c, oh, ow] = x[n, c,
                                         oh * POOL_S: oh * POOL_S + POOL_K,
                                         ow * POOL_S: ow * POOL_S + POOL_K].max()
    v2 = np.tile(b.reshape(1, C_OUT, 1, 1), (N, 1, OH, OW)).astype(np.float32)
    for n in range(N):
        for ci in range(C_IN):
            for co in range(C_OUT):
                for ih in range(PH):
                    for iw in range(PW):
                        for kh in range(K):
                            for kw in range(K):
                                oh = ih * STRIDE - PAD + kh * DIL
                                ow = iw * STRIDE - PAD + kw * DIL
                                if 0 <= oh < OH and 0 <= ow < OW:
                                    v2[n, co, oh, ow] += v1[n, ci, ih, iw] * w[ci, co, kh, kw]
    v5 = np.clip(v2 + 3.0, 0.0, 6.0)
    return v2 * v5 / 6.0


if __name__ == "__main__":
    key = jax.random.PRNGKey(0)
    kx, kw, kb = jax.random.split(key, 3)

    x = jax.random.normal(kx, (N, C_IN, H, W), dtype=jnp.float32)
    # Deterministic ConvTranspose2d params (PyTorch layout: (in, out, kH, kW))
    bound = 1.0 / np.sqrt(C_IN * K * K)
    weight = jax.random.uniform(kw, (C_IN, C_OUT, K, K), jnp.float32, -bound, bound)
    bias = jax.random.uniform(kb, (C_OUT,), jnp.float32, -bound, bound)

    # Build the scatter matrix ONCE (device-resident constant reused every call).
    m_aug = jax.device_put(build_conv_transpose_matrix(weight, bias))

    out = model_forward(x, m_aug)
    out = jax.block_until_ready(out)

    ref = reference_forward(np.asarray(x), np.asarray(weight), np.asarray(bias))
    assert out.shape == (N, C_OUT, OH, OW), out.shape
    np.testing.assert_allclose(np.asarray(out), ref, rtol=1e-5, atol=1e-5)
    print("KERNEL_OK")
</pallas_src>

<mosaic_0001>
module attributes {stable_mosaic.version = 11 : i64} {
  func.func @fused_kernel(%arg0: memref<72xf32, #tpu.memory_space<smem>>, %arg1: memref<9x8x128xf32, #tpu.memory_space<vmem>>, %arg2: memref<8x128xf32, #tpu.memory_space<vmem>>) attributes {dimension_semantics = [], scalar_prefetch = 0 : i64, scratch_operands = 0 : i64, tpu.core_type = #tpu.core_type<tc>} {
    %c0 = arith.constant 0 : index
    %0 = memref.load %arg0[%c0] : memref<72xf32, #tpu.memory_space<smem>>
    %c1 = arith.constant 1 : index
    %1 = memref.load %arg0[%c1] : memref<72xf32, #tpu.memory_space<smem>>
    %2 = arith.maximumf %0, %1 : f32
    %c6 = arith.constant 6 : index
    %3 = memref.load %arg0[%c6] : memref<72xf32, #tpu.memory_space<smem>>
    %4 = arith.maximumf %2, %3 : f32
    %c7 = arith.constant 7 : index
    %5 = memref.load %arg0[%c7] : memref<72xf32, #tpu.memory_space<smem>>
    %6 = arith.maximumf %4, %5 : f32
    %c3 = arith.constant 3 : index
    %7 = memref.load %arg0[%c3] : memref<72xf32, #tpu.memory_space<smem>>
    %c4 = arith.constant 4 : index
    %8 = memref.load %arg0[%c4] : memref<72xf32, #tpu.memory_space<smem>>
    %9 = arith.maximumf %7, %8 : f32
    %c9 = arith.constant 9 : index
    %10 = memref.load %arg0[%c9] : memref<72xf32, #tpu.memory_space<smem>>
    %11 = arith.maximumf %9, %10 : f32
    %c10 = arith.constant 10 : index
    %12 = memref.load %arg0[%c10] : memref<72xf32, #tpu.memory_space<smem>>
    %13 = arith.maximumf %11, %12 : f32
    %c18 = arith.constant 18 : index
    %14 = memref.load %arg0[%c18] : memref<72xf32, #tpu.memory_space<smem>>
    %c19 = arith.constant 19 : index
    %15 = memref.load %arg0[%c19] : memref<72xf32, #tpu.memory_space<smem>>
    %16 = arith.maximumf %14, %15 : f32
    %c24 = arith.constant 24 : index
    %17 = memref.load %arg0[%c24] : memref<72xf32, #tpu.memory_space<smem>>
    %18 = arith.maximumf %16, %17 : f32
    %c25 = arith.constant 25 : index
    %19 = memref.load %arg0[%c25] : memref<72xf32, #tpu.memory_space<smem>>
    %20 = arith.maximumf %18, %19 : f32
    %c21 = arith.constant 21 : index
    %21 = memref.load %arg0[%c21] : memref<72xf32, #tpu.memory_space<smem>>
    %c22 = arith.constant 22 : index
    %22 = memref.load %arg0[%c22] : memref<72xf32, #tpu.memory_space<smem>>
    %23 = arith.maximumf %21, %22 : f32
    %c27 = arith.constant 27 : index
    %24 = memref.load %arg0[%c27] : memref<72xf32, #tpu.memory_space<smem>>
    %25 = arith.maximumf %23, %24 : f32
    %c28 = arith.constant 28 : index
    %26 = memref.load %arg0[%c28] : memref<72xf32, #tpu.memory_space<smem>>
    %27 = arith.maximumf %25, %26 : f32
    %c36 = arith.constant 36 : index
    %28 = memref.load %arg0[%c36] : memref<72xf32, #tpu.memory_space<smem>>
    %c37 = arith.constant 37 : index
    %29 = memref.load %arg0[%c37] : memref<72xf32, #tpu.memory_space<smem>>
    %30 = arith.maximumf %28, %29 : f32
    %c42 = arith.constant 42 : index
    %31 = memref.load %arg0[%c42] : memref<72xf32, #tpu.memory_space<smem>>
    %32 = arith.maximumf %30, %31 : f32
    %c43 = arith.constant 43 : index
    %33 = memref.load %arg0[%c43] : memref<72xf32, #tpu.memory_space<smem>>
    %34 = arith.maximumf %32, %33 : f32
    %c39 = arith.constant 39 : index
    %35 = memref.load %arg0[%c39] : memref<72xf32, #tpu.memory_space<smem>>
    %c40 = arith.constant 40 : index
    %36 = memref.load %arg0[%c40] : memref<72xf32, #tpu.memory_space<smem>>
    %37 = arith.maximumf %35, %36 : f32
    %c45 = arith.constant 45 : index
    %38 = memref.load %arg0[%c45] : memref<72xf32, #tpu.memory_space<smem>>
    %39 = arith.maximumf %37, %38 : f32
    %c46 = arith.constant 46 : index
    %40 = memref.load %arg0[%c46] : memref<72xf32, #tpu.memory_space<smem>>
    %41 = arith.maximumf %39, %40 : f32
    %c54 = arith.constant 54 : index
    %42 = memref.load %arg0[%c54] : memref<72xf32, #tpu.memory_space<smem>>
    %c55 = arith.constant 55 : index
    %43 = memref.load %arg0[%c55] : memref<72xf32, #tpu.memory_space<smem>>
    %44 = arith.maximumf %42, %43 : f32
    %c60 = arith.constant 60 : index
    %45 = memref.load %arg0[%c60] : memref<72xf32, #tpu.memory_space<smem>>
    %46 = arith.maximumf %44, %45 : f32
    %c61 = arith.constant 61 : index
    %47 = memref.load %arg0[%c61] : memref<72xf32, #tpu.memory_space<smem>>
    %48 = arith.maximumf %46, %47 : f32
    %c57 = arith.constant 57 : index
    %49 = memref.load %arg0[%c57] : memref<72xf32, #tpu.memory_space<smem>>
    %c58 = arith.constant 58 : index
    %50 = memref.load %arg0[%c58] : memref<72xf32, #tpu.memory_space<smem>>
    %51 = arith.maximumf %49, %50 : f32
    %c63 = arith.constant 63 : index
    %52 = memref.load %arg0[%c63] : memref<72xf32, #tpu.memory_space<smem>>
    %53 = arith.maximumf %51, %52 : f32
    %c64 = arith.constant 64 : index
    %54 = memref.load %arg0[%c64] : memref<72xf32, #tpu.memory_space<smem>>
    %55 = arith.maximumf %53, %54 : f32
    %c0_0 = arith.constant 0 : index
    %c0_1 = arith.constant 0 : index
    %c0_2 = arith.constant 0 : index
    %56 = vector.load %arg1[%c0_0, %c0_1, %c0_2] : memref<9x8x128xf32, #tpu.memory_space<vmem>>, vector<1x8x128xf32>
    %57 = vector.shape_cast %56 : vector<1x8x128xf32> to vector<8x128xf32>
    %58 = vector.broadcast %6 : f32 to vector<8x128xf32>
    %59 = arith.mulf %58, %57 : vector<8x128xf32>
    %c1_3 = arith.constant 1 : index
    %c0_4 = arith.constant 0 : index
    %c0_5 = arith.constant 0 : index
    %60 = vector.load %arg1[%c1_3, %c0_4, %c0_5] : memref<9x8x128xf32, #tpu.memory_space<vmem>>, vector<1x8x128xf32>
    %61 = vector.shape_cast %60 : vector<1x8x128xf32> to vector<8x128xf32>
    %62 = vector.broadcast %13 : f32 to vector<8x128xf32>
    %63 = arith.mulf %62, %61 : vector<8x128xf32>
    %c2 = arith.constant 2 : index
    %c0_6 = arith.constant 0 : index
    %c0_7 = arith.constant 0 : index
    %64 = vector.load %arg1[%c2, %c0_6, %c0_7] : memref<9x8x128xf32, #tpu.memory_space<vmem>>, vector<1x8x128xf32>
    %65 = vector.shape_cast %64 : vector<1x8x128xf32> to vector<8x128xf32>
    %66 = vector.broadcast %20 : f32 to vector<8x128xf32>
    %67 = arith.mulf %66, %65 : vector<8x128xf32>
    %c3_8 = arith.constant 3 : index
    %c0_9 = arith.constant 0 : index
    %c0_10 = arith.constant 0 : index
    %68 = vector.load %arg1[%c3_8, %c0_9, %c0_10] : memref<9x8x128xf32, #tpu.memory_space<vmem>>, vector<1x8x128xf32>
    %69 = vector.shape_cast %68 : vector<1x8x128xf32> to vector<8x128xf32>
    %70 = vector.broadcast %27 : f32 to vector<8x128xf32>
    %71 = arith.mulf %70, %69 : vector<8x128xf32>
    %c4_11 = arith.constant 4 : index
    %c0_12 = arith.constant 0 : index
    %c0_13 = arith.constant 0 : index
    %72 = vector.load %arg1[%c4_11, %c0_12, %c0_13] : memref<9x8x128xf32, #tpu.memory_space<vmem>>, vector<1x8x128xf32>
    %73 = vector.shape_cast %72 : vector<1x8x128xf32> to vector<8x128xf32>
    %74 = vector.broadcast %34 : f32 to vector<8x128xf32>
    %75 = arith.mulf %74, %73 : vector<8x128xf32>
    %c5 = arith.constant 5 : index
    %c0_14 = arith.constant 0 : index
    %c0_15 = arith.constant 0 : index
    %76 = vector.load %arg1[%c5, %c0_14, %c0_15] : memref<9x8x128xf32, #tpu.memory_space<vmem>>, vector<1x8x128xf32>
    %77 = vector.shape_cast %76 : vector<1x8x128xf32> to vector<8x128xf32>
    %78 = vector.broadcast %41 : f32 to vector<8x128xf32>
    %79 = arith.mulf %78, %77 : vector<8x128xf32>
    %c6_16 = arith.constant 6 : index
    %c0_17 = arith.constant 0 : index
    %c0_18 = arith.constant 0 : index
    %80 = vector.load %arg1[%c6_16, %c0_17, %c0_18] : memref<9x8x128xf32, #tpu.memory_space<vmem>>, vector<1x8x128xf32>
    %81 = vector.shape_cast %80 : vector<1x8x128xf32> to vector<8x128xf32>
    %82 = vector.broadcast %48 : f32 to vector<8x128xf32>
    %83 = arith.mulf %82, %81 : vector<8x128xf32>
    %c7_19 = arith.constant 7 : index
    %c0_20 = arith.constant 0 : index
    %c0_21 = arith.constant 0 : index
    %84 = vector.load %arg1[%c7_19, %c0_20, %c0_21] : memref<9x8x128xf32, #tpu.memory_space<vmem>>, vector<1x8x128xf32>
    %85 = vector.shape_cast %84 : vector<1x8x128xf32> to vector<8x128xf32>
    %86 = vector.broadcast %55 : f32 to vector<8x128xf32>
    %87 = arith.mulf %86, %85 : vector<8x128xf32>
    %c8 = arith.constant 8 : index
    %c0_22 = arith.constant 0 : index
    %c0_23 = arith.constant 0 : index
    %88 = vector.load %arg1[%c8, %c0_22, %c0_23] : memref<9x8x128xf32, #tpu.memory_space<vmem>>, vector<1x8x128xf32>
    %89 = vector.shape_cast %88 : vector<1x8x128xf32> to vector<8x128xf32>
    %90 = arith.addf %59, %63 : vector<8x128xf32>
    %91 = arith.addf %67, %71 : vector<8x128xf32>
    %92 = arith.addf %75, %79 : vector<8x128xf32>
    %93 = arith.addf %83, %87 : vector<8x128xf32>
    %94 = arith.addf %90, %91 : vector<8x128xf32>
    %95 = arith.addf %92, %93 : vector<8x128xf32>
    %96 = arith.addf %94, %95 : vector<8x128xf32>
    %97 = arith.addf %96, %89 : vector<8x128xf32>
    %cst = arith.constant 3.000000e+00 : f32
    %98 = vector.broadcast %cst : f32 to vector<8x128xf32>
    %99 = arith.addf %97, %98 : vector<8x128xf32>
    %cst_24 = arith.constant 0.000000e+00 : f32
    %cst_25 = arith.constant 6.000000e+00 : f32
    %100 = vector.broadcast %cst_24 : f32 to vector<8x128xf32>
    %101 = arith.maximumf %100, %99 : vector<8x128xf32>
    %102 = vector.broadcast %cst_25 : f32 to vector<8x128xf32>
    %103 = arith.minimumf %102, %101 : vector<8x128xf32>
    %104 = arith.mulf %97, %103 : vector<8x128xf32>
    %cst_26 = arith.constant 0.166666672 : f32
    %105 = vector.broadcast %cst_26 : f32 to vector<8x128xf32>
    %106 = arith.mulf %104, %105 : vector<8x128xf32>
    %c0_27 = arith.constant 0 : index
    %c0_28 = arith.constant 0 : index
    %107 = vector.load %arg2[%c0_27, %c0_28] : memref<8x128xf32, #tpu.memory_space<vmem>>, vector<8x128xf32>
    tpu.vector_store %arg2[%c0_27, %c0_28], %106 {strides = array<i32>} : memref<8x128xf32, #tpu.memory_space<vmem>>, vector<8x128xf32>,
    return
  }
}

</mosaic_0001>

<bundles_post_ra>
// kernel: model_forward.1
= control target key start
LH: loop header
LB: loop body
LE: loop exit
PB: predicated region body
PF: predicated region fallthrough
CT: control target
= control target key end

     0   :  { %s279_s0 = inlined_call_operand.vmem [shape: f32[72], index: 0, kind: input, shape index: {}]   ;;  %s280_s1 = inlined_call_operand.hbm [shape: f32[9,8,128], index: 1, kind: input, shape index: {}]   ;;  %s281_s2 = inlined_call_operand.vmem [shape: f32[8,128], index: 2, kind: output, shape index: {}]  }
   0x1   :  { %282 = sst [smem:[#allocation8_spill]] %s281_s2 }
   0x2   :  { %7 = vsyncpa [#allocation4], 0  ;;  %s14_s11 = sshll.u32 %s279_s0, 4  ;;  %s15_s11 = int_to_ptr.vmem [resolvable:$true] %s14_s11 }
   0x3   :  { %8 = vsyncpa [#allocation3], 0  ;;  %s22_s14 = sshll.u32 %s280_s1, 4  ;;  %s224_s15 = smov [#allocation2]   ;;  %s23_s14 = int_to_ptr.hbm [resolvable:$true] %s22_s14 }
   0x4   :  { %17 = dma.vmem_to_smem %s15_s11, 16, %s224_s15, [#allocation4]  }
   0x5   :  { %s225_s16 = smov [#allocation5]   ;;  %s226_s18 = smov 128  }
   0x6   :  { %s24_s17 = sshll.u32 %s225_s16, 4  ;;  %s227_s19 = smov 8   ;;  %s25_s17 = int_to_ptr.vmem [resolvable:$true] %s24_s17 }
   0x7   :  { %30 = dma.hbm_to_vmem [thread:$0]  %s23_s14, 1152, %s25_s17, [#allocation3], %s226_s18, %s226_s18, %s227_s19  }
   0x8   :  { %220 = dma.done.wait [#allocation4], 16  }
   0x9   :  { %221 = vsyncadd [#allocation4], 4294967280 }
   0xa   :  { %222 = dma.done.wait [#allocation3], 1152  }
   0xb   :  { %223 = vsyncadd [#allocation3], 4294966144 }
   0xc   :  { %39 = sfence }
   0xd   :  { %s40_s0 = sld [smem:[#allocation2]]  ;;  %v96_v0 = vld [vmem:[#allocation5] sm:$0xff]  ;;  %v100_v2 = vld [vmem:[#allocation5 + $0x8] sm:$0xff]  ;;  %v104_v4 = vld [vmem:[#allocation5 + $0x10] sm:$0xff] }
   0xe   :  { %s149_s20 = sld [smem:[#allocation2 + $0x1]]  ;;  %v108_v6 = vld [vmem:[#allocation5 + $0x18] sm:$0xff]  ;;  %v112_v8 = vld [vmem:[#allocation5 + $0x20] sm:$0xff]  ;;  %v116_v10 = vld [vmem:[#allocation5 + $0x28] sm:$0xff] }
   0xf   :  { %s150_s21 = sld [smem:[#allocation2 + $0x6]]  ;;  %v120_v16 = vld [vmem:[#allocation5 + $0x30] sm:$0xff]  ;;  %v124_v20 = vld [vmem:[#allocation5 + $0x38] sm:$0xff]  ;;  %v128_v30 = vld [vmem:[#allocation5 + $0x40] sm:$0xff] }
  0x10   :  { %s249_s22 = sld [smem:[#allocation2 + $0x7]] }
  0x11   :  { %s152_s1 = sld [smem:[#allocation2 + $0x3]] }
  0x12   :  { %s153_s23 = sld [smem:[#allocation2 + $0x4]] }
  0x13   :  { %s154_s24 = sld [smem:[#allocation2 + $0x9]] }
  0x14   :  { %s251_s25 = sld [smem:[#allocation2 + $0xa]]  ;;  %s42_s28 = smax.f32 %s149_s20, %s40_s0 }
  0x15   :  { %s156_s26 = sld [smem:[#allocation2 + $0x12]]  ;;  %s255_s4 = smax.f32 %s150_s21, %s42_s28 }
  0x16   :  { %s157_s27 = sld [smem:[#allocation2 + $0x13]]  ;;  %s46_s10 = smax.f32 %s249_s22, %s255_s4 }
  0x17   :  { %s158_s29 = sld [smem:[#allocation2 + $0x18]]  ;;  %v97_v1 = vstv %s46_s10 }
  0x18   :  { %s253_s30 = sld [smem:[#allocation2 + $0x19]]  ;;  %s49_s6 = smax.f32 %s153_s23, %s152_s1  ;;  %v98_v12 = vmul.f32 %v97_v1, %v96_v0 }
  0x19   :  { %s160_s3 = sld [smem:[#allocation2 + $0x15]]  ;;  %s261_s12 = smax.f32 %s154_s24, %s49_s6 }
  0x1a   :  { %s161_s5 = sld [smem:[#allocation2 + $0x16]]  ;;  %s53_s18 = smax.f32 %s251_s25, %s261_s12 }
  0x1b   :  { %s162_s7 = sld [smem:[#allocation2 + $0x1b]]  ;;  %v101_v3 = vstv %s53_s18 }
  0x1c   :  { %s56_s8 = smax.f32 %s157_s27, %s156_s26  ;;  %s257_s9 = sld [smem:[#allocation2 + $0x1c]]  ;;  %v102_v13 = vmul.f32 %v101_v3, %v100_v2 }
  0x1d   :  { %s164_s11 = sld [smem:[#allocation2 + $0x24]]  ;;  %s263_s14 = smax.f32 %s158_s29, %s56_s8 }
  0x1e   :  { %s165_s13 = sld [smem:[#allocation2 + $0x25]]  ;;  %s60_s0 = smax.f32 %s253_s30, %s263_s14  ;;  %v129_v22 = vadd.f32 %v102_v13, %v98_v12 }
  0x1f   :  { %s166_s15 = sld [smem:[#allocation2 + $0x2a]]  ;;  %v105_v5 = vstv %s60_s0 }
  0x20   :  { %s63_s16 = smax.f32 %s161_s5, %s160_s3  ;;  %s265_s17 = sld [smem:[#allocation2 + $0x2b]]  ;;  %v106_v14 = vmul.f32 %v105_v5, %v104_v4 }
  0x21   :  { %s168_s19 = sld [smem:[#allocation2 + $0x27]]  ;;  %s65_s21 = smax.f32 %s162_s7, %s63_s16 }
  0x22   :  { %s169_s20 = sld [smem:[#allocation2 + $0x28]]  ;;  %s67_s27 = smax.f32 %s257_s9, %s65_s21 }
  0x23   :  { %s170_s22 = sld [smem:[#allocation2 + $0x2d]]  ;;  %v109_v7 = vstv %s67_s27 }
  0x24   :  { %s70_s1 = smax.f32 %s165_s13, %s164_s11  ;;  %s171_s23 = sld [smem:[#allocation2 + $0x2e]]  ;;  %v110_v15 = vmul.f32 %v109_v7, %v108_v6 }
  0x25   :  { %s72_s24 = smax.f32 %s166_s15, %s70_s1  ;;  %s172_s26 = sld [smem:[#allocation2 + $0x36]] }
  0x26   :  { %s173_s28 = sld [smem:[#allocation2 + $0x37]]  ;;  %s74_s29 = smax.f32 %s265_s17, %s72_s24  ;;  %v130_v23 = vadd.f32 %v110_v15, %v106_v14 }
  0x27   :  { %s174_s4 = sld [smem:[#allocation2 + $0x3c]]  ;;  %v113_v9 = vstv %s74_s29 }
  0x28   :  { %s77_s6 = smax.f32 %s169_s20, %s168_s19  ;;  %s175_s8 = sld [smem:[#allocation2 + $0x3d]]  ;;  %v114_v18 = vmul.f32 %v113_v9, %v112_v8  ;;  %v133_v28 = vadd.f32 %v130_v23, %v129_v22 }
  0x29   :  { %s79_s3 = smax.f32 %s170_s22, %s77_s6  ;;  %s273_s5 = sld [smem:[#allocation2 + $0x39]] }
  0x2a   :  { %s81_s2 = smax.f32 %s171_s23, %s79_s3  ;;  %s177_s25 = sld [smem:[#allocation2 + $0x3a]] }
  0x2b   :  { %s178_s30 = sld [smem:[#allocation2 + $0x3f]]  ;;  %v117_v11 = vstv %s81_s2 }
  0x2c   :  { %s84_s7 = smax.f32 %s173_s28, %s172_s26  ;;  %s179_s9 = sld [smem:[#allocation2 + $0x40]]  ;;  %v118_v19 = vmul.f32 %v117_v11, %v116_v10 }
  0x2d   :  { %s86_s11 = smax.f32 %s174_s4, %s84_s7  ;;  %s283_s16 = sld [smem:[#allocation8_spill]] }
  0x2e   :  { %s88_s12 = smax.f32 %s175_s8, %s86_s11  ;;  %v131_v26 = vadd.f32 %v118_v19, %v114_v18 }
  0x2f   :  { %v121_v17 = vstv %s88_s12 }
  0x30   :  { %s91_s10 = smax.f32 %s177_s25, %s273_s5  ;;  %v122_v21 = vmul.f32 %v121_v17, %v120_v16 }
  0x31   :  { %s93_s13 = smax.f32 %s178_s30, %s91_s10 }
  0x32   :  { %s95_s14 = smax.f32 %s179_s9, %s93_s13 }
  0x33   :  { %v125_v24 = vstv %s95_s14 }
  0x34   :  { %v126_v25 = vmul.f32 %v125_v24, %v124_v20 }
  0x36   :  { %v132_v27 = vadd.f32 %v126_v25, %v122_v21 }
  0x38   :  { %v134_v29 = vadd.f32 %v132_v27, %v131_v26 }
  0x3a   :  { %v135_v31 = vadd.f32 %v134_v29, %v133_v28 }
  0x3c   :  { %v136_v32 = vadd.f32 %v135_v31, %v128_v30 }
  0x3e   :  { %v137_v33 = vadd.f32 3.0, %v136_v32 }
  0x40   :  { %v138_v34 = vmax.f32 %v137_v33, 0.0 }
  0x42   :  { %v139_v35 = vmin.f32 %v138_v34, 6.0 }
  0x44   :  { %v140_v36 = vmul.f32 %v139_v35, %v136_v32 }
  0x46   :  { %v141_v37 = vmul.f32 0.16666667, %v140_v36 }
  0x48   :  { %142 = vst [vmem:[%s283_s16] sm:$0xff] %v141_v37 }
  0x49   :  { %147 = vsyncpa [#allocation3], 1 }
  0x4a   :  { %148 = vsyncpa [#allocation4], 1 }

</bundles_post_ra>
